<compile_context>
chip_gen: v5e
topology: v5e:2x2
jax: 0.10.0
libtpu: 0.0.40
codegen_flags: <defaults>
</compile_context>

<pallas_src>
import jax
import jax.numpy as jnp
from jax.experimental import pallas as pl
from jax.experimental.pallas import tpu as pltpu


def _signum_kernel(x_ref, o_ref):
    x = x_ref[...]
    dt = x.dtype
    one = jnp.asarray(1, dtype=dt)
    neg_one = jnp.asarray(-1, dtype=dt)
    out = jnp.where(x >= 0, one, neg_one)
    if jnp.issubdtype(dt, jnp.floating):
        # torch.sign(NaN) = NaN, and the (Z == 0) fix-up leaves NaN untouched.
        out = jnp.where(jnp.isnan(x), x, out)
    o_ref[...] = out


def _signum_jnp(x):
    """Reference / fallback path (fused XLA elementwise, 1 read + 1 write)."""
    dt = x.dtype
    out = jnp.where(x >= 0, jnp.asarray(1, dt), jnp.asarray(-1, dt))
    if jnp.issubdtype(dt, jnp.floating):
        out = jnp.where(jnp.isnan(x), x, out)
    return out


def _cdiv(a, b):
    return -(-a // b)


def _round_up(a, b):
    return _cdiv(a, b) * b


def _device_info():
    """(device_kind_lower, num_tensorcores_per_chip)."""
    try:
        kind = jax.devices()[0].device_kind.lower()
    except Exception:
        return "unknown", 1
    num_tc = 2 if ("v7" in kind or "7x" in kind) else 1
    return kind, num_tc


def _default_block_bytes(kind, num_tc):
    # ~4 MiB tiles sit on the measured 85-86% HBM-roofline plateau for
    # mem-bound streaming ops; double-buffered in+out = 16 MiB, comfortably
    # inside scoped VMEM on every generation (v5e bumped from 2 MiB per review
    # since we raise vmem_limit_bytes anyway).
    block = 4 << 20
    if num_tc >= 2:
        # v7x guard: 64 MiB physical VMEM -> never exceed ~6 MiB per block.
        block = min(block, 6 << 20)
    return block


_SMALL_FASTPATH_BYTES = 512 * 1024


def signum_activation(x, *, block_bytes=None, min_pallas_bytes=_SMALL_FASTPATH_BYTES):
    """Elementwise signum with sign(0) := +1 (NaN preserved). Shape/dtype kept."""
    orig_shape = x.shape
    dtype = x.dtype
    n = x.size
    if n == 0:
        return x

    itemsize = jnp.dtype(dtype).itemsize
    total_bytes = n * itemsize

    # --- Fallback paths (no pallas_call) -------------------------------------
    # 1) Tiny tensors: custom-call + DMA pipeline fixed cost dominates.
    # 2) Non-128-aligned element counts: a padded/sliced Pallas path adds two
    #    extra full HBM passes; the fused jnp op is already a single
    #    read+write and therefore optimal for this memory-bound op.
    # TODO(synk): a masked non-dividing last block could keep the non-aligned
    # case inside Pallas without any extra HBM traffic.
    if total_bytes < min_pallas_bytes or n % 128 != 0:
        return _signum_jnp(x)

    # --- Lane-dense 2D view: pure reshape, no HBM copy -----------------------
    lane_w = 128
    for cand in (4096, 2048, 1024, 512, 256):
        if n % cand == 0:
            lane_w = cand
            break
    rows = n // lane_w
    x2d = x.reshape(rows, lane_w)

    sub = {4: 8, 2: 16, 1: 32}.get(itemsize, 8)  # sublane granularity per dtype
    kind, num_tc = _device_info()
    if block_bytes is None:
        block_bytes = _default_block_bytes(kind, num_tc)
    elif num_tc >= 2:
        block_bytes = min(block_bytes, 6 << 20)  # v7x: 64 MiB physical VMEM

    # --- Block sizing ---------------------------------------------------------
    row_bytes = lane_w * itemsize
    block_rows = max(sub, (block_bytes // row_bytes) // sub * sub)
    if block_rows >= rows:
        # Whole slab fits in one tile. On 1-TC chips (v5e/v6e) never split:
        # the grid is a serial loop there, so extra steps are pure overhead.
        block_rows = rows
    grid_steps = _cdiv(rows, block_rows)

    if num_tc >= 2 and total_bytes >= (1 << 20):
        # v7x: >= 2 steps per core so both TensorCores get work and each keeps
        # its input/output DMAs double-buffered.
        min_steps = 2 * num_tc
        if grid_steps < min_steps and rows >= min_steps * sub:
            block_rows = max(sub, _round_up(_cdiv(rows, min_steps), sub))
            grid_steps = _cdiv(rows, block_rows)

    actual_block_bytes = block_rows * row_bytes
    # double-buffered in+out (4 blocks) + headroom, capped at 32 MiB scoped.
    vmem_limit = min(32 << 20, max(16 << 20, 4 * actual_block_bytes + (4 << 20)))

    if num_tc >= 2 and grid_steps > 1:
        # Only CORE_PARALLEL actually shards the grid axis across v7x's 2 TCs.
        semantics_to_try = ((pltpu.CORE_PARALLEL,), ("parallel",))
    else:
        semantics_to_try = (("parallel",),)

    def _build(dim_sems):
        return pl.pallas_call(
            _signum_kernel,
            out_shape=jax.ShapeDtypeStruct((rows, lane_w), dtype),
            grid_spec=pltpu.PrefetchScalarGridSpec(
                num_scalar_prefetch=0,
                grid=(grid_steps,),
                in_specs=[pl.BlockSpec((block_rows, lane_w), lambda i: (i, 0))],
                out_specs=pl.BlockSpec((block_rows, lane_w), lambda i: (i, 0)),
            ),
            compiler_params=pltpu.CompilerParams(
                dimension_semantics=dim_sems,
                vmem_limit_bytes=vmem_limit,
            ),
            cost_estimate=pl.CostEstimate(
                flops=0,
                transcendentals=0,
                bytes_accessed=2 * n * itemsize,
            ),
        )

    out2d = None
    last_err = None
    for dim_sems in semantics_to_try:
        try:
            out2d = _build(dim_sems)(x2d)
            break
        except Exception as e:  # noqa: BLE001 — fall back if CORE_PARALLEL rejected
            last_err = e
            out2d = None
    if out2d is None:
        raise last_err

    return out2d.reshape(orig_shape)


def _reference(x):
    """Mirrors the PyTorch module: Z = sign(x); Z[Z == 0] = 1 (NaN stays NaN)."""
    z = jnp.sign(x)
    return jnp.where(z == 0, jnp.ones_like(z), z)


if __name__ == "__main__":
    key = jax.random.PRNGKey(0)
    # Small NCHW input consistent with a conv-style activation.
    x = jax.random.normal(key, (2, 4, 16, 16), dtype=jnp.float32)
    # Exercise the sign(0) -> +1 path, -0.0 -> +1, and NaN passthrough.
    x = x.at[0, 0, 0, :4].set(0.0)
    x = x.at[0, 0, 1, 0].set(-0.0)
    x = x.at[1, 3, 15, 15].set(jnp.nan)

    # Primary check: force the Pallas path even for this tiny example.
    y = signum_activation(x, min_pallas_bytes=0)
    y = jax.block_until_ready(y)
    ref = _reference(x)
    assert y.shape == x.shape and y.dtype == x.dtype
    assert bool(jnp.array_equal(y, ref, equal_nan=True))

    # Secondary checks: default wrapper (small-tensor fast path) and a
    # non-128-aligned shape (jnp fallback path).
    y_fast = jax.block_until_ready(signum_activation(x))
    assert bool(jnp.array_equal(y_fast, ref, equal_nan=True))

    x_odd = jax.random.normal(jax.random.PRNGKey(0), (3, 5, 7), dtype=jnp.float32)
    y_odd = jax.block_until_ready(signum_activation(x_odd))
    assert bool(jnp.array_equal(y_odd, _reference(x_odd)))

    print("KERNEL_OK")
</pallas_src>

<mosaic_0001>
module attributes {stable_mosaic.version = 11 : i64} {
  func.func @_signum_kernel(%arg0: i32, %arg1: memref<1x2048xf32, #tpu.memory_space<vmem>>, %arg2: memref<1x2048xf32, #tpu.memory_space<vmem>>) attributes {dimension_semantics = [#tpu.dimension_semantics<parallel>], iteration_bounds = array<i64: 1>, scalar_prefetch = 0 : i64, scratch_operands = 0 : i64, tpu.core_type = #tpu.core_type<tc>, window_params = [{transform_indices = @transform_0, window_bounds = array<i64: 1, 2048>}, {transform_indices = @transform_1, window_bounds = array<i64: 1, 2048>}]} {
    %c0 = arith.constant 0 : index
    %c0_0 = arith.constant 0 : index
    %0 = vector.load %arg1[%c0, %c0_0] : memref<1x2048xf32, #tpu.memory_space<vmem>>, vector<1x2048xf32>
    %cst = arith.constant 0.000000e+00 : f32
    %1 = vector.broadcast %cst : f32 to vector<1x2048xf32>
    %2 = arith.cmpf oge, %0, %1 : vector<1x2048xf32>
    %cst_1 = arith.constant 1.000000e+00 : f32
    %cst_2 = arith.constant -1.000000e+00 : f32
    %3 = vector.broadcast %cst_1 : f32 to vector<1x2048xf32>
    %4 = vector.broadcast %cst_2 : f32 to vector<1x2048xf32>
    %5 = arith.select %2, %3, %4 : vector<1x2048xi1>, vector<1x2048xf32>
    %6 = arith.cmpf one, %0, %0 : vector<1x2048xf32>
    %7 = arith.select %6, %0, %5 : vector<1x2048xi1>, vector<1x2048xf32>
    %c0_3 = arith.constant 0 : index
    %c0_4 = arith.constant 0 : index
    %8 = vector.load %arg2[%c0_3, %c0_4] : memref<1x2048xf32, #tpu.memory_space<vmem>>, vector<1x2048xf32>
    tpu.vector_store %arg2[%c0_3, %c0_4], %7 {strides = array<i32>} : memref<1x2048xf32, #tpu.memory_space<vmem>>, vector<1x2048xf32>,
    return
  }
  func.func @transform_0(%arg0: i32) -> (i32, i32) {
    %c0_i32 = arith.constant 0 : i32
    %c0_i32_0 = arith.constant 0 : i32
    return %arg0, %c0_i32 : i32, i32
  }
  func.func @transform_1(%arg0: i32) -> (i32, i32) {
    %c0_i32 = arith.constant 0 : i32
    %c0_i32_0 = arith.constant 0 : i32
    return %arg0, %c0_i32 : i32, i32
  }
}

</mosaic_0001>

<bundles_post_ra>
// kernel: tpu_custom_call.1
= control target key start
LH: loop header
LB: loop body
LE: loop exit
PB: predicated region body
PF: predicated region fallthrough
CT: control target
= control target key end

     0   :  { %6 = vsyncpa [#allocation3], 0  ;;  %s126_s0 = inlined_call_operand.hbm [shape: f32[1,2048], index: 0, kind: input, shape index: {}]   ;;  %s127_s1 = inlined_call_operand.hbm [shape: f32[1,2048], index: 1, kind: output, shape index: {}]  }
   0x1   :  { %7 = vsyncpa [#allocation4], 0  ;;  %s13_s8 = sshll.u32 %s126_s0, 4  ;;  %s107_s9 = smov [#allocation2]   ;;  %s14_s8 = int_to_ptr.hbm [resolvable:$true] %s13_s8 }
   0x2   :  { %s15_s10 = sshll.u32 %s107_s9, 4  ;;  %s16_s10 = int_to_ptr.vmem [resolvable:$true] %s15_s10 }
   0x3   :  { %18 = dma.hbm_to_vmem [thread:$0]  %s14_s8, 256, %s16_s10, [#allocation3]  }
   0x4   :  { %103 = dma.done.wait [#allocation3], 256  }
   0x5   :  { %104 = vsyncadd [#allocation3], 4294967040  ;;  %v23_v0 = vld [vmem:[#allocation2] sm:$0xff]  ;;  %v24_v1 = vld [vmem:[#allocation2 + $0x8] sm:$0xff]  ;;  %s108_s11 = smov [#allocation5]   ;;  %s42_s15 = sshll.u32 %s127_s1, 4  ;;  %s43_s15 = int_to_ptr.hbm [resolvable:$true] %s42_s15 }
   0x6   :  { %s40_s12 = sshll.u32 %s108_s11, 4  ;;  %vm25_vm0 = vcmp.ge.f32.partialorder %v23_v0, 0.0  ;;  %vm29_vm1 = vcmp.ne.f32.partialorder %v23_v0, %v23_v0  ;;  %vm26_vm2 = vcmp.ge.f32.partialorder %v24_v1, 0.0  ;;  %vm30_vm3 = vcmp.ne.f32.partialorder %v24_v1, %v24_v1  ;;  %s41_s12 = int_to_ptr.vmem [resolvable:$true] %s40_s12 }
   0x7   :  { %v109_v2 = vmov -1.0  }
   0x8   :  { %v27_v3 = vsel %vm25_vm0, 1.0, %v109_v2  ;;  %v28_v4 = vsel %vm26_vm2, 1.0, %v109_v2 }
   0x9   :  { %v31_v5 = vsel %vm29_vm1, %v23_v0, %v27_v3  ;;  %v32_v6 = vsel %vm30_vm3, %v24_v1, %v28_v4 }
   0xa   :  { %33 = vst [vmem:[#allocation5] sm:$0xff] %v31_v5 }
   0xb   :  { %34 = vst [vmem:[#allocation5 + $0x8] sm:$0xff] %v32_v6 }
   0xc   :  { %45 = dma.vmem_to_hbm [thread:$0]  %s41_s12, 256, %s43_s15, [#allocation4]  }
   0xd   :  { %105 = dma.done.wait [#allocation4], 256  }
   0xe   :  { %106 = vsyncadd [#allocation4], 4294967040 }
   0xf   :  { %50 = vsyncpa [#allocation3], 1 }
  0x10   :  { %51 = vsyncpa [#allocation4], 1 }

</bundles_post_ra>
